<compile_context>
chip_gen: v7x
topology: tpu7x:2x2x1
jax: 0.10.0
libtpu: 0.0.40
codegen_flags: <defaults>
</compile_context>

<pallas_src>
import jax
import jax.numpy as jnp
from jax.experimental import pallas as pl
from jax.experimental.pallas import tpu as pltpu

# Make the f32 reference matmuls (and the in-kernel f32 dots) use full-precision
# accumulation so the f32 correctness check is meaningful.
jax.config.update("jax_default_matmul_precision", "highest")


def _sigmoid(v):
    # torch.sigmoid(v) == 1 / (1 + exp(-v)); written explicitly so the kernel only
    # relies on exp (EUP) + divide, and so kernel/reference use identical math.
    return 1.0 / (1.0 + jnp.exp(-v))


def _sin_cos(theta):
    """sin/cos for theta = pi*sigmoid(.) in (0, pi).

    Range-reduce to w = theta - pi/2 in (-pi/2, pi/2) and evaluate degree-13/14
    Horner polynomials (truncation error < 1e-9, i.e. float32-exact). This keeps
    the kernel on pure VPU mul/add instead of relying on transcendental sin/cos
    lowering inside Mosaic.
    """
    w = theta - 0.5 * jnp.pi
    w2 = w * w
    sw = w * (1.0 + w2 * (-1.0 / 6 + w2 * (1.0 / 120 + w2 * (-1.0 / 5040
          + w2 * (1.0 / 362880 + w2 * (-1.0 / 39916800 + w2 * (1.0 / 6227020800)))))))
    cw = 1.0 + w2 * (-0.5 + w2 * (1.0 / 24 + w2 * (-1.0 / 720 + w2 * (1.0 / 40320
          + w2 * (-1.0 / 3628800 + w2 * (1.0 / 479001600 + w2 * (-1.0 / 87178291200)))))))
    # theta = pi/2 + w  =>  sin(theta) = cos(w),  cos(theta) = -sin(w)
    return cw, -sw


def robot_kernel(x_ref, w1t_ref, acos_ref, asin_ref, consts_ref, uconst_ref, o_ref):
    x = x_ref[...]                                  # (TB, N) f32 activations
    c = consts_ref[...]                             # (2, N) f32: packed [b1 ; joints]
    b1 = c[0:1, :]
    joints = c[1:2, :]                              # [joints_left | joints_right]
    wdt = w1t_ref.dtype                             # f32 or bf16 (MXU operands only)

    # fcc1 + get_angles:  angles = 0.5*pi + pi*(sigmoid(x@W1.T + b1) - 0.5) = pi*sigmoid(.)
    logits = jnp.dot(x.astype(wdt), w1t_ref[...],
                     preferred_element_type=jnp.float32) + b1
    angles = jnp.pi * _sigmoid(logits)              # in (0, pi)

    # constrain: ratio = 1 + (sigmoid(x) - 0.5);  rods = ratio * joints
    rods = (0.5 + _sigmoid(x)) * joints             # (TB, N) = [rods_l | rods_r]
    sin_t, cos_t = _sin_cos(angles)
    rc = rods * cos_t                               # [rods_l*cos_l | rods_r*cos_r]
    rs = rods * sin_t                               # [rods_l*sin_l | rods_r*sin_r]

    # Folded output map: u = rc @ A_cos + rs @ A_sin + u_const
    u = jnp.dot(rc.astype(wdt), acos_ref[...], preferred_element_type=jnp.float32)
    u = u + jnp.dot(rs.astype(wdt), asin_ref[...], preferred_element_type=jnp.float32)
    u = u + uconst_ref[...]
    o_ref[...] = u.astype(o_ref.dtype)


def fold_robot_params(W1, b1, W2, b2, mats, joints, coo_diff,
                      param_dtype=jnp.bfloat16):
    """Fold all static linear algebra of RobotNetwork.forward into kernel operands."""
    M1, M2, M3, M4, M5 = mats
    H, D = M1.shape
    N = 2 * H
    f32 = jnp.float32

    # Suffix-sum operator: (p @ L)[b, i] = sum_{j >= i} p[b, j]  (== triu/repeat/bmm).
    L = jnp.tril(jnp.ones((H, H), f32))
    # fcc2 then mat_list[-1]:  bc_u @ (W2.T @ M5)
    W25 = W2.astype(f32).T @ M5.astype(f32)                      # (2N, D)
    G = (M1 + W25[0:H], M2 + W25[H:2 * H],
         M3 + W25[2 * H:3 * H], M4 + W25[3 * H:4 * H])           # per-component maps
    A = [L @ g for g in G]                                       # (H, D) each
    a_cos = jnp.concatenate([A[0], A[2]], axis=0)                # lx (cos_l) | rx (cos_r)
    a_sin = jnp.concatenate([A[1], A[3]], axis=0)                # ly (sin_l) | ry (sin_r)
    u_const = (coo_diff[0] @ G[0] + coo_diff[1] @ G[1]
               + coo_diff[2] @ G[2] + coo_diff[3] @ G[3] + b2 @ M5)

    return dict(
        w1t=W1.T.astype(param_dtype),                            # pre-transposed fcc1 weight
        a_cos=a_cos.astype(param_dtype),
        a_sin=a_sin.astype(param_dtype),
        consts=jnp.stack([b1, jnp.concatenate([joints[0], joints[1]])],
                         axis=0).astype(f32),                    # packed (2, N)
        u_const=u_const.reshape(1, D).astype(f32),
    )


def robot_forward(x, params, *, block_b=128):
    B, N = x.shape
    w1t, a_cos, a_sin = params["w1t"], params["a_cos"], params["a_sin"]
    consts, u_const = params["consts"], params["u_const"]
    D = a_cos.shape[1]

    block_b = min(block_b, B)
    assert B % block_b == 0, "pad the batch to a multiple of block_b"
    grid = (B // block_b,)

    return pl.pallas_call(
        robot_kernel,
        out_shape=jax.ShapeDtypeStruct((B, D), jnp.float32),
        grid=grid,
        in_specs=[
            pl.BlockSpec((block_b, N), lambda i: (i, 0)),   # x: tiled over batch
            pl.BlockSpec((N, N), lambda i: (0, 0)),         # W1^T: pinned resident
            pl.BlockSpec((N, D), lambda i: (0, 0)),         # A_cos: pinned resident
            pl.BlockSpec((N, D), lambda i: (0, 0)),         # A_sin: pinned resident
            pl.BlockSpec((2, N), lambda i: (0, 0)),         # packed [b1 ; joints]
            pl.BlockSpec((1, D), lambda i: (0, 0)),         # folded constant row
        ],
        out_specs=pl.BlockSpec((block_b, D), lambda i: (i, 0)),
        compiler_params=pltpu.CompilerParams(
            dimension_semantics=("parallel",),              # pipeline + shard across TCs
        ),
    )(x, w1t, a_cos, a_sin, consts, u_const)


def reference_forward(x, W1, b1, W2, b2, mats, joints, coo_diff):
    """Direct JAX transcription of RobotNetwork.forward / constrain (dense mat_list)."""
    M1, M2, M3, M4, M5 = mats
    B, N = x.shape
    H = N // 2
    z = _sigmoid(x @ W1.T + b1)                                  # fcc1
    angles = 0.5 * jnp.pi + 0.5 * jnp.pi * 2.0 * (z - 0.5)       # get_angles
    ratio = 1.0 + (_sigmoid(x) - 0.5)
    rods_l = ratio[:, :H] * joints[0]
    rods_r = ratio[:, H:] * joints[1]
    triu = jnp.triu(jnp.ones((H, H), x.dtype))                   # unsqueeze/repeat/triu
    Tl = rods_l[:, None, :] * triu[None, :, :]
    Tr = rods_r[:, None, :] * triu[None, :, :]
    cl = jnp.cos(angles[:, :H])[..., None]
    sl = jnp.sin(angles[:, :H])[..., None]
    cr = jnp.cos(angles[:, H:])[..., None]
    sr = jnp.sin(angles[:, H:])[..., None]
    lx = jnp.matmul(Tl, cl)[..., 0] + coo_diff[0]
    ly = jnp.matmul(Tl, sl)[..., 0] + coo_diff[1]
    rx = jnp.matmul(Tr, cr)[..., 0] + coo_diff[2]
    ry = jnp.matmul(Tr, sr)[..., 0] + coo_diff[3]
    bc_u = jnp.concatenate([lx, ly, rx, ry], axis=1)
    # batch_mat_vec(M.transpose(0,1), v) == v @ M   (M stored densely here)
    lx_u, ly_u, rx_u, ry_u = lx @ M1, ly @ M2, rx @ M3, ry @ M4
    int_u = (bc_u @ W2.T + b2) @ M5                              # fcc2, then mat_list[-1]
    return lx_u + ly_u + rx_u + ry_u + int_u


if __name__ == "__main__":
    B = 32                  # batch
    N = 64                  # args.input_size (even; H = N//2 rods per arm)
    H = N // 2
    S1 = 64                 # shapes[1] (fcc2 output width)
    D = 128                 # total DOF dim (columns of the mat_list maps), lane-dense

    key = jax.random.PRNGKey(0)
    keys = jax.random.split(key, 12)

    x = jax.random.normal(keys[0], (B, N), dtype=jnp.float32)

    # fcc1 / fcc2 parameters. (The module zero-initialises them; small random values
    # are used here so the check exercises every code path — forward semantics are
    # parameter-agnostic.)
    bnd1 = 1.0 / (N ** 0.5)
    W1 = jax.random.uniform(keys[1], (N, N), minval=-bnd1, maxval=bnd1)
    b1 = jax.random.uniform(keys[2], (N,), minval=-bnd1, maxval=bnd1)
    bnd2 = 1.0 / ((2 * N) ** 0.5)
    W2 = jax.random.uniform(keys[3], (S1, 2 * N), minval=-bnd2, maxval=bnd2)
    b2 = jax.random.uniform(keys[4], (S1,), minval=-bnd2, maxval=bnd2)

    # Dense stand-ins for the sparse graph matrices mat_list[1..5].
    M1 = 0.1 * jax.random.normal(keys[5], (H, D))
    M2 = 0.1 * jax.random.normal(keys[6], (H, D))
    M3 = 0.1 * jax.random.normal(keys[7], (H, D))
    M4 = 0.1 * jax.random.normal(keys[8], (H, D))
    M5 = 0.1 * jax.random.normal(keys[9], (S1, D))
    mats = (M1, M2, M3, M4, M5)

    joints = jax.random.uniform(keys[10], (2, H), minval=0.5, maxval=1.5)   # rod lengths
    coo_diff = 0.1 * jax.random.normal(keys[11], (4, H))                    # coord offsets

    ref = reference_forward(x, W1, b1, W2, b2, mats, joints, coo_diff)

    def rel_err(a, b):
        return float(jnp.linalg.norm(a - b) / (jnp.linalg.norm(b) + 1e-12))

    # f32 weights: validates the algebraic folding and the kernel itself.
    params_f32 = fold_robot_params(W1, b1, W2, b2, mats, joints, coo_diff,
                                   param_dtype=jnp.float32)
    out_f32 = jax.block_until_ready(robot_forward(x, params_f32, block_b=8))
    assert out_f32.shape == (B, D)
    e32 = rel_err(out_f32, ref)
    assert e32 < 1e-2, f"f32 kernel mismatch vs reference: rel_err={e32}"

    # bf16 MXU operands (f32 accumulation, f32 elementwise): the fast default path.
    params_bf16 = fold_robot_params(W1, b1, W2, b2, mats, joints, coo_diff,
                                    param_dtype=jnp.bfloat16)
    out_bf16 = jax.block_until_ready(robot_forward(x, params_bf16, block_b=8))
    e16 = rel_err(out_bf16, ref)
    assert e16 < 3e-2, f"bf16 kernel mismatch vs reference: rel_err={e16}"

    print("KERNEL_OK")
</pallas_src>

<mosaic_0001>
module attributes {stable_mosaic.version = 11 : i64} {
  func.func @robot_kernel(%arg0: i32, %arg1: memref<8x64xf32, #tpu.memory_space<vmem>>, %arg2: memref<64x64xf32, #tpu.memory_space<vmem>>, %arg3: memref<64x128xf32, #tpu.memory_space<vmem>>, %arg4: memref<64x128xf32, #tpu.memory_space<vmem>>, %arg5: memref<2x64xf32, #tpu.memory_space<vmem>>, %arg6: memref<1x128xf32, #tpu.memory_space<vmem>>, %arg7: memref<8x128xf32, #tpu.memory_space<vmem>>) attributes {dimension_semantics = [#tpu.dimension_semantics<parallel>], iteration_bounds = array<i64: 4>, scalar_prefetch = 0 : i64, scratch_operands = 0 : i64, tpu.core_type = #tpu.core_type<tc>, window_params = [{transform_indices = @transform_0, window_bounds = array<i64: 8, 64>}, {pipeline_mode = #tpu.pipeline_mode<synchronous>, transform_indices = @transform_1, window_bounds = array<i64: 64, 64>}, {pipeline_mode = #tpu.pipeline_mode<synchronous>, transform_indices = @transform_2, window_bounds = array<i64: 64, 128>}, {pipeline_mode = #tpu.pipeline_mode<synchronous>, transform_indices = @transform_3, window_bounds = array<i64: 64, 128>}, {pipeline_mode = #tpu.pipeline_mode<synchronous>, transform_indices = @transform_4, window_bounds = array<i64: 2, 64>}, {pipeline_mode = #tpu.pipeline_mode<synchronous>, transform_indices = @transform_5, window_bounds = array<i64: 1, 128>}, {transform_indices = @transform_6, window_bounds = array<i64: 8, 128>}]} {
    %c0 = arith.constant 0 : index
    %c0_0 = arith.constant 0 : index
    %0 = vector.load %arg1[%c0, %c0_0] : memref<8x64xf32, #tpu.memory_space<vmem>>, vector<8x64xf32>
    %c0_1 = arith.constant 0 : index
    %c0_2 = arith.constant 0 : index
    %1 = vector.load %arg5[%c0_1, %c0_2] : memref<2x64xf32, #tpu.memory_space<vmem>>, vector<2x64xf32>
    %2 = vector.extract_strided_slice %1 {offsets = [0, 0], sizes = [1, 64], strides = [1, 1]} : vector<2x64xf32> to vector<1x64xf32>
    %3 = vector.extract_strided_slice %1 {offsets = [1, 0], sizes = [1, 64], strides = [1, 1]} : vector<2x64xf32> to vector<1x64xf32>
    %c0_3 = arith.constant 0 : index
    %c0_4 = arith.constant 0 : index
    %4 = vector.load %arg2[%c0_3, %c0_4] : memref<64x64xf32, #tpu.memory_space<vmem>>, vector<64x64xf32>
    %cst = arith.constant dense<0.000000e+00> : vector<8x64xf32>
    %5 = tpu.matmul %0, %4, %cst {dimension_numbers = #tpu.dot_dimension_numbers<[1], [0], [0], [1], [0, 0, 1, 1], [], []>, precision = #tpu.contract_precision<fp32>} : vector<8x64xf32>, vector<64x64xf32>, vector<8x64xf32> -> vector<8x64xf32>
    %6 = vector.broadcast %2 : vector<1x64xf32> to vector<8x64xf32>
    %7 = arith.addf %5, %6 : vector<8x64xf32>
    %cst_5 = arith.constant 0.000000e+00 : f32
    %8 = vector.broadcast %cst_5 : f32 to vector<8x64xf32>
    %9 = arith.subf %8, %7 : vector<8x64xf32>
    %10 = math.exp %9 : vector<8x64xf32>
    %cst_6 = arith.constant 1.000000e+00 : f32
    %11 = vector.broadcast %cst_6 : f32 to vector<8x64xf32>
    %12 = arith.addf %11, %10 : vector<8x64xf32>
    %cst_7 = arith.constant 1.000000e+00 : f32
    %13 = vector.broadcast %cst_7 : f32 to vector<8x64xf32>
    %14 = arith.divf %13, %12 : vector<8x64xf32>
    %cst_8 = arith.constant 3.14159274 : f32
    %15 = vector.broadcast %cst_8 : f32 to vector<8x64xf32>
    %16 = arith.mulf %15, %14 : vector<8x64xf32>
    %cst_9 = arith.constant 0.000000e+00 : f32
    %17 = vector.broadcast %cst_9 : f32 to vector<8x64xf32>
    %18 = arith.subf %17, %0 : vector<8x64xf32>
    %19 = math.exp %18 : vector<8x64xf32>
    %cst_10 = arith.constant 1.000000e+00 : f32
    %20 = vector.broadcast %cst_10 : f32 to vector<8x64xf32>
    %21 = arith.addf %20, %19 : vector<8x64xf32>
    %cst_11 = arith.constant 1.000000e+00 : f32
    %22 = vector.broadcast %cst_11 : f32 to vector<8x64xf32>
    %23 = arith.divf %22, %21 : vector<8x64xf32>
    %cst_12 = arith.constant 5.000000e-01 : f32
    %24 = vector.broadcast %cst_12 : f32 to vector<8x64xf32>
    %25 = arith.addf %24, %23 : vector<8x64xf32>
    %26 = vector.broadcast %3 : vector<1x64xf32> to vector<8x64xf32>
    %27 = arith.mulf %25, %26 : vector<8x64xf32>
    %cst_13 = arith.constant 1.57079637 : f32
    %28 = vector.broadcast %cst_13 : f32 to vector<8x64xf32>
    %29 = arith.subf %16, %28 : vector<8x64xf32>
    %30 = arith.mulf %29, %29 : vector<8x64xf32>
    %cst_14 = arith.constant 1.60590444E-10 : f32
    %31 = vector.broadcast %cst_14 : f32 to vector<8x64xf32>
    %32 = arith.mulf %30, %31 : vector<8x64xf32>
    %cst_15 = arith.constant -2.50521079E-8 : f32
    %33 = vector.broadcast %cst_15 : f32 to vector<8x64xf32>
    %34 = arith.addf %33, %32 : vector<8x64xf32>
    %35 = arith.mulf %30, %34 : vector<8x64xf32>
    %cst_16 = arith.constant 2.75573188E-6 : f32
    %36 = vector.broadcast %cst_16 : f32 to vector<8x64xf32>
    %37 = arith.addf %36, %35 : vector<8x64xf32>
    %38 = arith.mulf %30, %37 : vector<8x64xf32>
    %cst_17 = arith.constant -1.98412701E-4 : f32
    %39 = vector.broadcast %cst_17 : f32 to vector<8x64xf32>
    %40 = arith.addf %39, %38 : vector<8x64xf32>
    %41 = arith.mulf %30, %40 : vector<8x64xf32>
    %cst_18 = arith.constant 0.00833333377 : f32
    %42 = vector.broadcast %cst_18 : f32 to vector<8x64xf32>
    %43 = arith.addf %42, %41 : vector<8x64xf32>
    %44 = arith.mulf %30, %43 : vector<8x64xf32>
    %cst_19 = arith.constant -0.166666672 : f32
    %45 = vector.broadcast %cst_19 : f32 to vector<8x64xf32>
    %46 = arith.addf %45, %44 : vector<8x64xf32>
    %47 = arith.mulf %30, %46 : vector<8x64xf32>
    %cst_20 = arith.constant 1.000000e+00 : f32
    %48 = vector.broadcast %cst_20 : f32 to vector<8x64xf32>
    %49 = arith.addf %48, %47 : vector<8x64xf32>
    %50 = arith.mulf %29, %49 : vector<8x64xf32>
    %cst_21 = arith.constant -1.14707454E-11 : f32
    %51 = vector.broadcast %cst_21 : f32 to vector<8x64xf32>
    %52 = arith.mulf %30, %51 : vector<8x64xf32>
    %cst_22 = arith.constant 2.08767559E-9 : f32
    %53 = vector.broadcast %cst_22 : f32 to vector<8x64xf32>
    %54 = arith.addf %53, %52 : vector<8x64xf32>
    %55 = arith.mulf %30, %54 : vector<8x64xf32>
    %cst_23 = arith.constant -2.755732E-7 : f32
    %56 = vector.broadcast %cst_23 : f32 to vector<8x64xf32>
    %57 = arith.addf %56, %55 : vector<8x64xf32>
    %58 = arith.mulf %30, %57 : vector<8x64xf32>
    %cst_24 = arith.constant 2.48015876E-5 : f32
    %59 = vector.broadcast %cst_24 : f32 to vector<8x64xf32>
    %60 = arith.addf %59, %58 : vector<8x64xf32>
    %61 = arith.mulf %30, %60 : vector<8x64xf32>
    %cst_25 = arith.constant -0.00138888892 : f32
    %62 = vector.broadcast %cst_25 : f32 to vector<8x64xf32>
    %63 = arith.addf %62, %61 : vector<8x64xf32>
    %64 = arith.mulf %30, %63 : vector<8x64xf32>
    %cst_26 = arith.constant 0.0416666679 : f32
    %65 = vector.broadcast %cst_26 : f32 to vector<8x64xf32>
    %66 = arith.addf %65, %64 : vector<8x64xf32>
    %67 = arith.mulf %30, %66 : vector<8x64xf32>
    %cst_27 = arith.constant -5.000000e-01 : f32
    %68 = vector.broadcast %cst_27 : f32 to vector<8x64xf32>
    %69 = arith.addf %68, %67 : vector<8x64xf32>
    %70 = arith.mulf %30, %69 : vector<8x64xf32>
    %cst_28 = arith.constant 1.000000e+00 : f32
    %71 = vector.broadcast %cst_28 : f32 to vector<8x64xf32>
    %72 = arith.addf %71, %70 : vector<8x64xf32>
    %cst_29 = arith.constant 0.000000e+00 : f32
    %73 = vector.broadcast %cst_29 : f32 to vector<8x64xf32>
    %74 = arith.subf %73, %50 : vector<8x64xf32>
    %75 = arith.mulf %27, %74 : vector<8x64xf32>
    %76 = arith.mulf %27, %72 : vector<8x64xf32>
    %c0_30 = arith.constant 0 : index
    %c0_31 = arith.constant 0 : index
    %77 = vector.load %arg3[%c0_30, %c0_31] : memref<64x128xf32, #tpu.memory_space<vmem>>, vector<64x128xf32>
    %cst_32 = arith.constant dense<0.000000e+00> : vector<8x128xf32>
    %78 = tpu.matmul %75, %77, %cst_32 {dimension_numbers = #tpu.dot_dimension_numbers<[1], [0], [0], [1], [0, 0, 1, 1], [], []>, precision = #tpu.contract_precision<fp32>} : vector<8x64xf32>, vector<64x128xf32>, vector<8x128xf32> -> vector<8x128xf32>
    %c0_33 = arith.constant 0 : index
    %c0_34 = arith.constant 0 : index
    %79 = vector.load %arg4[%c0_33, %c0_34] : memref<64x128xf32, #tpu.memory_space<vmem>>, vector<64x128xf32>
    %cst_35 = arith.constant dense<0.000000e+00> : vector<8x128xf32>
    %80 = tpu.matmul %76, %79, %cst_35 {dimension_numbers = #tpu.dot_dimension_numbers<[1], [0], [0], [1], [0, 0, 1, 1], [], []>, precision = #tpu.contract_precision<fp32>} : vector<8x64xf32>, vector<64x128xf32>, vector<8x128xf32> -> vector<8x128xf32>
    %81 = arith.addf %78, %80 : vector<8x128xf32>
    %c0_36 = arith.constant 0 : index
    %c0_37 = arith.constant 0 : index
    %82 = vector.load %arg6[%c0_36, %c0_37] : memref<1x128xf32, #tpu.memory_space<vmem>>, vector<1x128xf32>
    %83 = vector.broadcast %82 : vector<1x128xf32> to vector<8x128xf32>
    %84 = arith.addf %81, %83 : vector<8x128xf32>
    %c0_38 = arith.constant 0 : index
    %c0_39 = arith.constant 0 : index
    %85 = vector.load %arg7[%c0_38, %c0_39] : memref<8x128xf32, #tpu.memory_space<vmem>>, vector<8x128xf32>
    tpu.vector_store %arg7[%c0_38, %c0_39], %84 {strides = array<i32>} : memref<8x128xf32, #tpu.memory_space<vmem>>, vector<8x128xf32>,
    return
  }
  func.func @transform_0(%arg0: i32) -> (i32, i32) {
    %c0_i32 = arith.constant 0 : i32
    %c0_i32_0 = arith.constant 0 : i32
    return %arg0, %c0_i32 : i32, i32
  }
  func.func @transform_1(%arg0: i32) -> (i32, i32) {
    %c0_i32 = arith.constant 0 : i32
    %c0_i32_0 = arith.constant 0 : i32
    %c0_i32_1 = arith.constant 0 : i32
    return %c0_i32, %c0_i32_0 : i32, i32
  }
  func.func @transform_2(%arg0: i32) -> (i32, i32) {
    %c0_i32 = arith.constant 0 : i32
    %c0_i32_0 = arith.constant 0 : i32
    %c0_i32_1 = arith.constant 0 : i32
    return %c0_i32, %c0_i32_0 : i32, i32
  }
  func.func @transform_3(%arg0: i32) -> (i32, i32) {
    %c0_i32 = arith.constant 0 : i32
    %c0_i32_0 = arith.constant 0 : i32
    %c0_i32_1 = arith.constant 0 : i32
    return %c0_i32, %c0_i32_0 : i32, i32
  }
  func.func @transform_4(%arg0: i32) -> (i32, i32) {
    %c0_i32 = arith.constant 0 : i32
    %c0_i32_0 = arith.constant 0 : i32
    %c0_i32_1 = arith.constant 0 : i32
    return %c0_i32, %c0_i32_0 : i32, i32
  }
  func.func @transform_5(%arg0: i32) -> (i32, i32) {
    %c0_i32 = arith.constant 0 : i32
    %c0_i32_0 = arith.constant 0 : i32
    %c0_i32_1 = arith.constant 0 : i32
    return %c0_i32, %c0_i32_0 : i32, i32
  }
  func.func @transform_6(%arg0: i32) -> (i32, i32) {
    %c0_i32 = arith.constant 0 : i32
    %c0_i32_0 = arith.constant 0 : i32
    return %arg0, %c0_i32 : i32, i32
  }
}

</mosaic_0001>

<bundles_post_ra>
// kernel: tpu_custom_call.1
= control target key start
LH: loop header
LB: loop body
LE: loop exit
PB: predicated region body
PF: predicated region fallthrough
CT: control target
= control target key end

     0   :  { %11 = vsyncpa [#allocation3], 0  ;;  %s3890_s0 = inlined_call_operand.hbm [shape: f32[32,64], index: 0, kind: input, shape index: {}]   ;;  %s3891_s1 = inlined_call_operand.hbm [shape: f32[64,64], index: 1, kind: input, shape index: {}]   ;;  %s3892_s2 = inlined_call_operand.hbm [shape: f32[64,128], index: 2, kind: input, shape index: {}]   ;;  %s3893_s3 = inlined_call_operand.hbm [shape: f32[64,128], index: 3, kind: input, shape index: {}]   ;;  %s3894_s4 = inlined_call_operand.vmem [shape: f32[2,64], index: 4, kind: input, shape index: {}]   ;;  %s3895_s5 = inlined_call_operand.vmem [shape: f32[1,128], index: 5, kind: input, shape index: {}]   ;;  %s3896_s6 = inlined_call_operand.hbm [shape: f32[32,128], index: 6, kind: output, shape index: {}]  }
   0x1   :  { %13 = vsyncpa [#allocation3 + $0x1], 0 }
   0x2   :  { %14 = vsyncpa [#allocation6], 0 }
   0x3   :  { %15 = vsyncpa [#allocation9], 0 }
   0x4   :  { %16 = vsyncpa [#allocation4], 0 }
   0x5   :  { %18 = vsyncpa [#allocation4 + $0x1], 0  ;;  %s3211_s21 = smov 0   ;;  %s3213_s22 = smov 0  }
   0x6   :  { %s3215_s23 = smov 0   ;;  %s3217_s24 = smov 0  }
   0x7 LB: > { %s3232_s25 = sadd.s32 4294967295, %s3164_s24   ;;  %s2135_s26 = sadd.s32 4294967294, %s3164_s24   ;;  %s3164_s24 = sphi %s3217_s24, %s3918_s24   ;;  %s3160_s23 = sphi %s3215_s23, %s3917_s23   ;;  %s3156_s22 = sphi %s3213_s22, %s3916_s22   ;;  %s3152_s21 = sphi %s3211_s21, %s3915_s21  }
   0x8   : > { %p44_p0 = scmp.ne.s32.totalorder %s3156_s22, %s3152_s21  ;;  %p3897_p1 = scmp.eq.s32.totalorder %s3232_s25, 0 }
   0x9   : > { %p179_p3 = scmp.eq.s32.totalorder %s2135_s26, 3  ;;  %p2136_p5 = scmp.ge.s32.totalorder %s3164_s24, 1 }
   0xa   : > { %p3241_p4 = por %p3897_p1, %p44_p0  ;;  %p186_p7 = scmp.lt.s32.totalorder %s3164_s24, 5 }
   0xb   : > { %p3246_p6 = por %p179_p3, %p44_p0  ;;  %s3166_s30 = smov [#allocation5]  }
   0xc   : > { %s3900_s27 = scalar_select %p3241_p4, 1, 0 }
   0xd   : > { %s3901_s28 = scalar_select %p3246_p6, 1, 0 }
   0xe   : > { %p3251_p8 = pnand %p2136_p5, %p186_p7  ;;  %s198_s7 = sshll.u32 %s3166_s30, 4  ;;  %s3255_s7 = int_to_ptr.vmem [resolvable:$true] %s198_s7 }
   0xf   : > { %s3167_s9 = smov [#allocation7]   ;;  %s3168_s11 = smov [#allocation8]  }
  0x10   : > { %s3902_s29 = scalar_select %p3251_p8, 1, 0 }
  0x11   : > { %p2902_p9 = pneg %p3251_p8  ;;  %s211_s10 = sshll.u32 %s3167_s9, 4  ;;  %s3265_s10 = int_to_ptr.vmem [resolvable:$true] %s211_s10 }
  0x12   : > { %s3267_s12 = sshll.u32 %s3168_s11, 4  ;;  %s2976_s15 = scalar_lea.hbm %s3891_s1, 1024  ;;  %s225_s12 = int_to_ptr.vmem [resolvable:$true] %s3267_s12 }
  0x13   : > { %p3261_p10 = pnand %p2902_p9, %p3897_p1  ;;  %p2977_p11 = scmp.ne.s32.totalorder %s3891_s1, %s2976_s15 }
  0x14   : > { %p2983_p3 = scmp.lt.u32.totalorder %s2976_s15, %s3891_s1 }
  0x15   : > { %p3277_p12 = pneg %p3261_p10 }
  0x17   : > { %p2979_p13 = pnand %p3277_p12, %p2977_p11 }
  0x19   : > { %p2980_p0 = pneg %p2979_p13 }
  0x1b   : > { %p2985_p5 = pnand %p2983_p3, %p2980_p0 }
  0x1d   : > { %2988 = shalt.err (!%p2985_p5)
}
  0x1e   : > { %s2989_s26 = scalar_lea.vmem %s3255_s7, 1024  ;;  %p2997_p2 = scmp.lt.s32.totalorder %s3255_s7, %s3255_s7 }
  0x1f   : > { %p2990_p7 = scmp.ne.s32.totalorder %s3255_s7, %s2989_s26  ;;  %p2998_p6 = scmp.lt.s32.totalorder %s2989_s26, %s2989_s26 }
  0x21   : > { %p2992_p9 = pnand %p2990_p7, %p3277_p12  ;;  %p2999_p11 = por %p2998_p6, %p2997_p2 }
  0x23   : > { %p2993_p1 = pneg %p2992_p9 }
  0x25   : > { %p3000_p13 = pnand %p2999_p11, %p2993_p1 }
  0x27   : > { %3003 = shalt.err (!%p3000_p13)
}
  0x28   : > { %s3169_s30 = smov 128   ;;  %s3170_s9 = smov 8  }
  0x29   : > { %2905 = dma.hbm_to_vmem [thread:$0]  (!%p3261_p10), %s3891_s1, 1024, %s3255_s7, [#allocation6], %s3169_s30, %s3169_s30, %s3170_s9  }
  0x2a   : > { %s3004_s16 = scalar_lea.hbm %s3892_s2, 1024 }
  0x2b   : > { %p3005_p1 = scmp.ne.s32.totalorder %s3892_s2, %s3004_s16  ;;  %p3011_p0 = scmp.lt.u32.totalorder %s3004_s16, %s3892_s2 }
  0x2d   : > { %p3007_p2 = pnand %p3005_p1, %p3277_p12 }
  0x2f   : > { %p3008_p6 = pneg %p3007_p2 }
  0x31   : > { %p3013_p3 = pnand %p3011_p0, %p3008_p6 }
  0x33   : > { %3016 = shalt.err (!%p3013_p3)
}
  0x34   : > { %s3017_s7 = scalar_lea.vmem %s3265_s10, 1024  ;;  %p3025_p11 = scmp.lt.s32.totalorder %s3265_s10, %s3265_s10 }
  0x35   : > { %p3018_p5 = scmp.ne.s32.totalorder %s3265_s10, %s3017_s7  ;;  %p3026_p13 = scmp.lt.s32.totalorder %s3017_s7, %s3017_s7 }
  0x37   : > { %p3020_p7 = pnand %p3018_p5, %p3277_p12  ;;  %p3027_p1 = por %p3026_p13, %p3025_p11 }
  0x39   : > { %p3021_p9 = pneg %p3020_p7 }
  0x3b   : > { %p3028_p2 = pnand %p3027_p1, %p3021_p9 }
  0x3d   : > { %3031 = shalt.err (!%p3028_p2)
}
  0x3e   : > { %2908 = dma.hbm_to_vmem [thread:$0]  (!%p3261_p10), %s3892_s2, 1024, %s3265_s10, [#allocation6], %s3169_s30, %s3169_s30, %s3170_s9  }
  0x3f   : > { %s3032_s16 = scalar_lea.hbm %s3893_s3, 1024 }
  0x40   : > { %p3033_p6 = scmp.ne.s32.totalorder %s3893_s3, %s3032_s16  ;;  %p3039_p5 = scmp.lt.u32.totalorder %s3032_s16, %s3893_s3 }
  0x42   : > { %p3035_p0 = pnand %p3033_p6, %p3277_p12 }
  0x44   : > { %p3036_p3 = pneg %p3035_p0 }
  0x46   : > { %p3041_p7 = pnand %p3039_p5, %p3036_p3 }
  0x48   : > { %3044 = shalt.err (!%p3041_p7)
}
  0x49   : > { %s3045_s7 = scalar_lea.vmem %s225_s12, 1024  ;;  %p3053_p1 = scmp.lt.s32.totalorder %s225_s12, %s225_s12 }
  0x4a   : > { %p3046_p9 = scmp.ne.s32.totalorder %s225_s12, %s3045_s7  ;;  %p3054_p2 = scmp.lt.s32.totalorder %s3045_s7, %s3045_s7 }
  0x4c   : > { %p3048_p11 = pnand %p3046_p9, %p3277_p12  ;;  %p3055_p4 = por %p3054_p2, %p3053_p1 }
  0x4e   : > { %p3049_p13 = pneg %p3048_p11 }
  0x50   : > { %p3056_p8 = pnand %p3055_p4, %p3049_p13 }
  0x52   : > { %3059 = shalt.err (!%p3056_p8)
}
  0x53   : > { %2911 = dma.hbm_to_vmem [thread:$0]  (!%p3261_p10), %s3893_s3, 1024, %s225_s12, [#allocation9], %s3169_s30, %s3169_s30, %s3170_s9  }
  0x54   : > { %s3350_s18 = sadd.s32 1, %s3164_s24   ;;  %s31_s13 = sadd.s32 1, %s3160_s23 }
  0x55   : > { %s28_s8 = ssub.s32 %s3164_s24, %s3350_s18  ;;  %p38_p8 = scmp.ne.s32.totalorder %s3160_s23, %s3156_s22 }
  0x56   : > { %p29_p4 = scmp.eq.s32.totalorder %s28_s8, 0  ;;  %p39_p12 = scmp.eq.s32.totalorder %s3164_s24, 0 }
  0x57   : > { %p2923_p6 = scmp.lt.s32.totalorder %s3164_s24, 4  ;;  %p3905_p3 = scmp.eq.s32.totalorder %s3232_s25, 3 }
  0x58   : > { %s3360_s14 = scalar_select %p29_p4, %s3160_s23, %s31_s13  }
  0x59   : > { %p40_p0 = por %p39_p12, %p38_p8  ;;  %p3364_p5 = por %p3905_p3, %p38_p8 }
  0x5a   : > { %s244_s16 = sand.u32 1, %s3160_s23   ;;  %s2142_s17 = sshll.u32 %s3164_s24, 7 }
  0x5b   : > { %s2141_s12 = sshll.u32 %s244_s16, 3  ;;  %s3373_s19 = scalar_lea.hbm %s3890_s0, %s2142_s17 }
  0x5c   : > { %s248_s20 = scalar_lea.vmem [#allocation2], %s2141_s12  ;;  %p3375_p10 = pnand %p2923_p6, %p40_p0 }
  0x5d   : > { %s255_s26 = sshll.u32 %s248_s20, 4  ;;  %s245_s10 = scalar_lea.sflag [#allocation3], %s244_s16  ;;  %s3379_s26 = int_to_ptr.vmem [resolvable:$true] %s255_s26 }
  0x5e   : > { %s3060_s11 = scalar_lea.hbm %s3373_s19, 128  ;;  %p3062_p9 = pneg %p3375_p10 }
  0x5f   : > { %p3061_p7 = scmp.ne.s32.totalorder %s3373_s19, %s3060_s11  ;;  %s3065_s17 = scalar_lea.hbm %s3890_s0, 512 }
  0x60   : > { %p3066_p1 = scmp.lt.u32.totalorder %s3373_s19, %s3890_s0  ;;  %p3067_p2 = scmp.lt.u32.totalorder %s3065_s17, %s3060_s11 }
  0x61   : > { %p3063_p11 = pnand %p3062_p9, %p3061_p7  ;;  %p3069_p8 = scmp.lt.u32.totalorder %s3060_s11, %s3373_s19 }
  0x62   : > { %p3068_p4 = por %p3067_p2, %p3066_p1 }
  0x63   : > { %p3064_p13 = pneg %p3063_p11 }
  0x64   : > { %p3070_p12 = por %p3069_p8, %p3068_p4 }
  0x66   : > { %p3071_p6 = pnand %p3070_p12, %p3064_p13 }
  0x68   : > { %3074 = shalt.err (!%p3071_p6)
}
  0x69   : > { %s3075_s16 = scalar_lea.vmem %s3379_s26, 128  ;;  %s3171_s9 = smov [#allocation2]  }
  0x6a   : > { %p3076_p0 = scmp.ne.s32.totalorder %s3379_s26, %s3075_s16  ;;  %s3080_s20 = sshll.u32 %s3171_s9, 4  ;;  %s3081_s20 = int_to_ptr.vmem [resolvable:$false] %s3080_s20 }
  0x6b   : > { %s3082_s8 = scalar_lea.vmem %s3081_s20, 256  ;;  %p3083_p11 = scmp.lt.s32.totalorder %s3379_s26, %s3081_s20 }
  0x6c   : > { %p3078_p3 = pnand %p3076_p0, %p3062_p9  ;;  %p3084_p1 = scmp.lt.s32.totalorder %s3082_s8, %s3075_s16 }
  0x6e   : > { %p3079_p7 = pneg %p3078_p3  ;;  %p3085_p2 = por %p3084_p1, %p3083_p11 }
  0x70   : > { %p3086_p4 = pnand %p3085_p2, %p3079_p7 }
  0x72   : > { %3089 = shalt.err (!%p3086_p4)
}
  0x73   : > { %2915 = dma.hbm_to_vmem [thread:$0]  (!%p3375_p10), %s3373_s19, 128, %s3379_s26, %s245_s10  }
  0x74   : > { %p3908_p13 = scmp.ne.s32.totalorder %s3902_s29, 0 }
  0x75   : > { %s3409_s11 = sand.u32 (!%p3908_p13), 1, %s3156_s22   ;;  %p3909_p9 = scmp.ne.s32.totalorder (!%p3908_p13), %s3900_s27, 0 }
  0x76   : > { %264 = sbr.rel (%p3908_p13) target bundleno = 881 (0x371), region = 44  ;;  %s2144_s13 = sshll.u32 (!%p3908_p13), %s3409_s11, 3 }
  0x77   : > { %s267_s17 = scalar_lea.sflag (!%p3908_p13), [#allocation3], %s3409_s11  ;;  %s270_s12 = scalar_lea.vmem (!%p3908_p13), [#allocation2], %s2144_s13 }
  0x7d   : > { %3135 = dma.done.wait (%p3909_p9), %s267_s17, 128  }
  0x7e   : > { %3137 = vsyncadd (%p3909_p9), %s267_s17, 4294967168  ;;  %p3910_p10 = scmp.eq.s32.totalorder %s3232_s25, 0 }
  0x80   : > { %3139 = dma.done.wait (%p3910_p10), [#allocation6], 2048   ;;  %p3911_p8 = pmov %p3910_p10 }
  0x82   : > { %3141 = vsyncadd (%p3911_p8), [#allocation6], 4294965248  ;;  %p3912_p12 = pmov %p3911_p8 }
  0x83   : > { %p3913_p6 = pmov %p3911_p8 }
  0x84   : > { %3143 = dma.done.wait (%p3912_p12), [#allocation9], 1024  }
  0x85   : > { %3145 = vsyncadd (%p3913_p6), [#allocation9], 4294966272  ;;  %v3172_v0 = vmov 0.0|0.0   ;;  %vm3173_vm0 = vmmov 0   ;;  %v3174_v1 = vmov 0.0   ;;  %v313_v2 = vld [vmem:[#allocation5] sm:$0xff] }
  0x86   : > { %2659 = vmatprep.subr.bf16.mxu0 %v3172_v0  ;;  %2333 = vmatprep.mubr.msk.f32.mxu0 %vm3173_vm0, %v3174_v1  ;;  %v314_v3 = vld [vmem:[#allocation5 + $0x8] sm:$0xff]  ;;  %v315_v4 = vld [vmem:[#allocation5 + $0x10] sm:$0xff]  ;;  %v330_v5 = vand.u32 4294901760, %v313_v2  ;;  %v316_v7 = vld [vmem:[#allocation5 + $0x18] sm:$0xff]  ;;  %vm325_vm1 = vcmask 523264   ;;  %s2152_s7 = sshll.u32 %s3232_s25, 7 }
  0x87   : > { %2731 = vmatprep.subr.bf16.mxu1 %v3172_v0  ;;  %2447 = vmatprep.mubr.msk.f32.mxu1 %vm3173_vm0, %v3174_v1  ;;  %v333_v6 = vand.u32 4294901760, %v314_v3  ;;  %v336_v8 = vand.u32 4294901760, %v315_v4  ;;  %v317_v9 = vld [vmem:[#allocation5 + $0x20] sm:$0xff]  ;;  %v339_v10 = vand.u32 4294901760, %v316_v7  ;;  %v318_v11 = vld [vmem:[#allocation5 + $0x28] sm:$0xff]  ;;  %v3433_v12 = vld [vmem:[%s270_s12] sm:$0xff]  ;;  %s3847_s20 = scalar_lea.hbm %s3896_s6, %s2152_s7 }
  0x88   : > { %v3437_v14 = vsub.f32 %v313_v2, %v330_v5  ;;  %v342_v17 = vand.u32 4294901760, %v317_v9  ;;  %v319_v18 = vld [vmem:[#allocation5 + $0x30] sm:$0xff]  ;;  %v320_v19 = vld [vmem:[#allocation5 + $0x38] sm:$0xff]  ;;  %v345_v22 = vand.u32 4294901760, %v318_v11  ;;  %v327_v23 = vsel %vm325_vm1, %v3433_v12, 0  ;;  %s310_s10 = scalar_lea.vmem [#allocation10], %s2144_s13 }
  0x89   : > { %v3435_v13 = vpack.c.bf16 %v333_v6, %v330_v5  ;;  %v3439_v15 = vsub.f32 %v314_v3, %v333_v6  ;;  %v3441_v16 = vsub.f32 %v315_v4, %v336_v8  ;;  %v3444_v20 = vpack.c.bf16 %v339_v10, %v336_v8  ;;  %s2036_s30 = sshll.u32 %s310_s10, 4  ;;  %s2023_s8 = scalar_lea.sflag [#allocation4], %s3409_s11  ;;  %s3849_s30 = int_to_ptr.vmem [resolvable:$true] %s2036_s30 }
  0x8a   : > { %v3446_v21 = vsub.f32 %v316_v7, %v339_v10  ;;  %v3451_v24 = vand.u32 4294901760, %v327_v23  ;;  %v415_v25 = vand.u32 4294901760, %v3437_v14  ;;  %v348_v27 = vand.u32 4294901760, %v319_v18  ;;  %s3090_s17 = scalar_lea.vmem %s3849_s30, 128  ;;  %s3175_s25 = smov [#allocation10]  }
  0x8b   : > { %2661 = vmatpush3.bf16.msra.mxu0 %v3435_v13  ;;  %v422_v26 = vand.u32 4294901760, %v3439_v15  ;;  %v351_v28 = vand.u32 4294901760, %v320_v19  ;;  %v3455_v29 = vsub.f32 %v317_v9, %v342_v17  ;;  %v3457_v30 = vsub.f32 %v318_v11, %v345_v22  ;;  %v925_v11 = vld [vmem:[#allocation8] sm:$0xff]  ;;  %p3091_p0 = scmp.ne.s32.totalorder %s3849_s30, %s3090_s17  ;;  %s3094_s13 = sshll.u32 %s3175_s25, 4  ;;  %s3095_s13 = int_to_ptr.vmem [resolvable:$false] %s3094_s13 }
  0x8c   : > { %2662 = vmatprep.subr.bf16.mxu0 %v3172_v0  ;;  %v3460_v31 = vsub.f32 %v327_v23, %v3451_v24  ;;  %v429_v32 = vand.u32 4294901760, %v3441_v16  ;;  %v3464_v33 = vpack.c.bf16 %v345_v22, %v342_v17  ;;  %v416_v34 = vsub.f32 %v3437_v14, %v415_v25  ;;  %v918_v17 = vld [vmem:[#allocation7 + $0x8] sm:$0xff]  ;;  %v927_v22 = vld [vmem:[#allocation8 + $0x10] sm:$0xff]  ;;  %v928_v23 = vld [vmem:[#allocation8 + $0x18] sm:$0xff]  ;;  %s3096_s12 = scalar_lea.vmem %s3095_s13, 256  ;;  %p3097_p11 = scmp.lt.s32.totalorder %s3849_s30, %s3095_s13 }
  0x8d   : > { %v423_v35 = vsub.f32 %v3439_v15, %v422_v26  ;;  %v436_v36 = vand.u32 4294901760, %v3446_v21  ;;  %v3475_v38 = vpack.c.bf16 %v351_v28, %v348_v27  ;;  %v3477_v39 = vsub.f32 %v319_v18, %v348_v27  ;;  %v920_v27 = vld [vmem:[#allocation7 + $0x18] sm:$0xff]  ;;  %p3092_p3 = pnand %p3091_p0, %p3364_p5  ;;  %p3098_p1 = scmp.lt.s32.totalorder %s3096_s12, %s3090_s17 }
  0x8e   : > { %v404_v37 = vand.u32 4294901760, %v3460_v31  ;;  %v430_v41 = vsub.f32 %v3441_v16, %v429_v32  ;;  %v443_v42 = vand.u32 4294901760, %v3455_v29  ;;  %v450_v43 = vand.u32 4294901760, %v3457_v30 }
  0x8f   : > { %2664 = vmatpush3.bf16.msra.mxu0 %v3444_v20  ;;  %v3488_v44 = vsub.f32 %v320_v19, %v351_v28  ;;  %v417_v45 = vand.u32 4294901760, %v416_v34  ;;  %v424_v46 = vand.u32 4294901760, %v423_v35  ;;  %v437_v47 = vsub.f32 %v3446_v21, %v436_v36  ;;  %v921_v34 = vld [vmem:[#allocation7 + $0x20] sm:$0xff]  ;;  %p3093_p7 = pneg %p3092_p3  ;;  %p3099_p2 = por %p3098_p1, %p3097_p11 }
  0x90   : > { %2665 = vmatprep.subr.bf16.mxu0 %v3172_v0  ;;  %v405_v40 = vsub.f32 %v3460_v31, %v404_v37  ;;  %v431_v49 = vand.u32 4294901760, %v430_v41  ;;  %v444_v50 = vsub.f32 %v3455_v29, %v443_v42  ;;  %v451_v51 = vsub.f32 %v3457_v30, %v450_v43 }
  0x91   : > { %v2672_v52 = vpack.c.bf16 %v424_v46, %v417_v45  ;;  %v438_v53 = vand.u32 4294901760, %v437_v47  ;;  %v457_v54 = vand.u32 4294901760, %v3477_v39  ;;  %v464_v55 = vand.u32 4294901760, %v3488_v44  ;;  %v932_v45 = vld [vmem:[#allocation8 + $0x38] sm:$0xff]  ;;  %p3100_p4 = pnand %p3099_p2, %p3093_p7 }
  0x92   : > { %v406_v48 = vand.u32 4294901760, %v405_v40  ;;  %v445_v56 = vand.u32 4294901760, %v444_v50  ;;  %v452_v58 = vand.u32 4294901760, %v451_v51  ;;  %v2684_v3 = vpack.c.bf16 %v3439_v15, %v3437_v14  ;;  %v917_v14 = vld [vmem:[#allocation7] sm:$0xff]  ;;  %v923_v50 = vld [vmem:[#allocation7 + $0x30] sm:$0xff]  ;;  %v924_v51 = vld [vmem:[#allocation7 + $0x38] sm:$0xff] }
  0x93   : > { %2667 = vmatpush3.bf16.msra.mxu0 %v3464_v33  ;;  %v2675_v57 = vpack.c.bf16 %v438_v53, %v431_v49  ;;  %v458_v59 = vsub.f32 %v3477_v39, %v457_v54  ;;  %v465_v60 = vsub.f32 %v3488_v44, %v464_v55  ;;  %v2687_v4 = vpack.c.bf16 %v3446_v21, %v3441_v16 }
  0x94   : > { %2668 = vmatprep.subr.bf16.mxu0 %v3172_v0  ;;  %v2678_v61 = vpack.c.bf16 %v452_v58, %v445_v56  ;;  %v2690_v5 = vpack.c.bf16 %v3457_v30, %v3455_v29  ;;  %v2693_v6 = vpack.c.bf16 %v3488_v44, %v3477_v39  ;;  %v2708_v7 = vpack.c.bf16 %v422_v26, %v415_v25  ;;  %v919_v25 = vld [vmem:[#allocation7 + $0x10] sm:$0xff] }
  0x95   : > { %v459_v62 = vand.u32 4294901760, %v458_v59  ;;  %v466_v63 = vand.u32 4294901760, %v465_v60  ;;  %v2711_v8 = vpack.c.bf16 %v436_v36, %v429_v32  ;;  %v2714_v9 = vpack.c.bf16 %v450_v43, %v443_v42  ;;  %v929_v32 = vld [vmem:[#allocation8 + $0x20] sm:$0xff]  ;;  %v931_v44 = vld [vmem:[#allocation8 + $0x30] sm:$0xff] }
  0x96   : > { %v2717_v10 = vpack.c.bf16 %v464_v55, %v457_v54  ;;  %v937_v15 = vand.u32 4294901760, %v925_v11  ;;  %v1477_v18 = vand.u32 4294901760, %v917_v14  ;;  %v1480_v19 = vand.u32 4294901760, %v918_v17 }
  0x97   : > { %2670 = vmatpush3.bf16.msra.mxu0 %v3475_v38  ;;  %v2681_v2 = vpack.c.bf16 %v466_v63, %v459_v62  ;;  %v946_v26 = vand.u32 4294901760, %v928_v23  ;;  %v1483_v28 = vand.u32 4294901760, %v919_v25  ;;  %v1486_v29 = vand.u32 4294901760, %v920_v27 }
  0x98   : > { %2671 = vmatprep.subr.bf16.mxu0 %v3172_v0  ;;  %v3574_v21 = vpack.c.bf16 %v1480_v19, %v1477_v18  ;;  %v949_v35 = vand.u32 4294901760, %v929_v32  ;;  %v3587_v40 = vsub.f32 %v925_v11, %v937_v15  ;;  %v3596_v46 = vsub.f32 %v917_v14, %v1477_v18 }
  0x99   : > { %v3598_v47 = vsub.f32 %v918_v17, %v1480_v19  ;;  %v3602_v49 = vsub.f32 %v928_v23, %v946_v26  ;;  %v3607_v53 = vsub.f32 %v920_v27, %v1486_v29  ;;  %v955_v58 = vand.u32 4294901760, %v931_v44 }
  0x9a   : > { %2334 = vmatmul.mubr.f32.vlgmr.msra.gmra.mrb[0].mxu0 %v406_v48  ;;  %v3609_v54 = vsub.f32 %v929_v32, %v949_v35  ;;  %v958_v59 = vand.u32 4294901760, %v932_v45  ;;  %v1495_v60 = vand.u32 4294901760, %v923_v50  ;;  %v1022_v62 = vand.u32 4294901760, %v3587_v40 }
  0x9b   : > { %2673 = vmatpush3.bf16.msra.mxu0 %v2672_v52  ;;  %2352 = vmatprep.mubr.msk.f32.mxu0 %vm3173_vm0, %v3174_v1  ;;  %v3605_v52 = vsub.f32 %v919_v25, %v1483_v28  ;;  %v1043_v11 = vand.u32 4294901760, %v3602_v49 }
  0x9c   : > { %2674 = vmatprep.subr.bf16.mxu0 %v3172_v0  ;;  %v1050_v17 = vand.u32 4294901760, %v3609_v54 }
  0x9e   : > { %v1051_v25 = vsub.f32 %v3609_v54, %v1050_v17 }
  0x9f   : > { %2676 = vmatpush3.bf16.msra.mxu0 %v2675_v57 }
  0xa0   : > { %2677 = vmatprep.subr.bf16.mxu0 %v3172_v0  ;;  %v1052_v27 = vand.u32 4294901760, %v1051_v25 }
  0xa3   : > { %2679 = vmatpush3.bf16.msra.mxu0 %v2678_v61  ;;  %v1498_v61 = vand.u32 4294901760, %v924_v51 }
  0xa4   : > { %2680 = vmatprep.subr.bf16.mxu0 %v3172_v0 }
  0xa7   : > { %2682 = vmatpush3.bf16.msra.mxu0 %v2681_v2  ;;  %v3622_v2 = vpack.c.bf16 %v958_v59, %v955_v58 }
  0xa8   : > { %2683 = vmatprep.subr.bf16.mxu0 %v3172_v0 }
  0xaa   : > { %2353 = vmatmul.mubr.f32.vlgmr.msra.gmra.mrb[0].mxu0 %v3451_v24 }
  0xab   : > { %2685 = vmatpush3.bf16.msra.mxu0 %v2684_v3  ;;  %2371 = vmatprep.mubr.msk.f32.mxu0 %vm3173_vm0, %v3174_v1  ;;  %v3624_v3 = vsub.f32 %v931_v44, %v955_v58 }
  0xac   : > { %2686 = vmatprep.subr.bf16.mxu0 %v3172_v0 }
  0xaf   : > { %2688 = vmatpush3.bf16.msra.mxu0 %v2687_v4  ;;  %v3626_v4 = vsub.f32 %v932_v45, %v958_v59 }
  0xb0   : > { %2689 = vmatprep.subr.bf16.mxu0 %v3172_v0 }
  0xb1   : > { %v1071_v32 = vand.u32 4294901760, %v3626_v4 }
  0xb3   : > { %2691 = vmatpush3.bf16.msra.mxu0 %v2690_v5  ;;  %v3628_v5 = vpack.c.bf16 %v1498_v61, %v1495_v60 }
  0xb4   : > { %2692 = vmatprep.subr.bf16.mxu0 %v3172_v0 }
  0xb7   : > { %2694 = vmatpush3.bf16.msra.mxu0 %v2693_v6  ;;  %v3630_v6 = vsub.f32 %v923_v50, %v1495_v60  ;;  %v2765_v50 = vpack.c.bf16 %v3626_v4, %v3624_v3  ;;  %v312_v60 = vld [vmem:[%s3894_s4] sm:$0x3] }
  0xb8   : > { %2695 = vmatprep.subr.bf16.mxu0 %v3172_v0 }
  0xba   : > { %2372 = vmatmul.mubr.f32.vlgmr.msra.gmra.mrb[0].mxu0 %v3460_v31  ;;  %v3582_v31 = vpack.c.bf16 %v1486_v29, %v1483_v28  ;;  %v1064_v29 = vand.u32 4294901760, %v3624_v3 }
  0xbb   : > { %2697 = vmatpush3.bf16.msra.mxu0 %v3435_v13  ;;  %2390 = vmatprep.mubr.msk.f32.mxu0 %vm3173_vm0, %v3174_v1 }
  0xbc   : > { %2698 = vmatprep.subr.bf16.mxu0 %v3172_v0  ;;  %v3677_v25 = vpack.c.bf16 %v1071_v32, %v1064_v29 }
  0xbf   : > { %2700 = vmatpush3.bf16.msra.mxu0 %v3444_v20 }
  0xc0   : > { %2701 = vmatprep.subr.bf16.mxu0 %v3172_v0 }
  0xc3   : > { %2703 = vmatpush3.bf16.msra.mxu0 %v3464_v33 }
  0xc4   : > { %2704 = vmatprep.subr.bf16.mxu0 %v3172_v0 }
  0xc7   : > { %2706 = vmatpush3.bf16.msra.mxu0 %v3475_v38 }
  0xc8   : > { %2707 = vmatprep.subr.bf16.mxu0 %v3172_v0 }
  0xca   : > { %2391 = vmatmul.mubr.f32.vlgmr.msra.gmra.mrb[0].mxu0 %v404_v37  ;;  %v922_v37 = vld [vmem:[#allocation7 + $0x28] sm:$0xff] }
  0xcb   : > { %2709 = vmatpush3.bf16.msra.mxu0 %v2708_v7  ;;  %2409 = vmatprep.mubr.msk.f32.mxu0 %vm3173_vm0, %v3174_v1  ;;  %v1492_v39 = vand.u32 4294901760, %v922_v37  ;;  %v3632_v7 = vsub.f32 %v924_v51, %v1498_v61  ;;  %v321_v51 = vlaneseq }
  0xcc   : > { %2710 = vmatprep.subr.bf16.mxu0 %v3172_v0 }
  0xcd   : > { %v3616_v57 = vsub.f32 %v922_v37, %v1492_v39  ;;  %v322_v58 = vshrl.u32 %v321_v51, 7 }
  0xcf   : > { %2712 = vmatpush3.bf16.msra.mxu0 %v2711_v8  ;;  %v1023_v8 = vsub.f32 %v3587_v40, %v1022_v62  ;;  %v323_v59 = vsub.s32 0, %v322_v58 }
  0xd0   : > { %2713 = vmatprep.subr.bf16.mxu0 %v3172_v0 }
  0xd1   : > { %v324_v61 = vrot.slane %v312_v60, %v323_v59 }
  0xd3   : > { %2715 = vmatpush3.bf16.msra.mxu0 %v2714_v9 }
  0xd4   : > { %2716 = vmatprep.subr.bf16.mxu0 %v3172_v0 }
  0xd7   : > { %2718 = vmatpush3.bf16.msra.mxu0 %v2717_v10 }
  0xd8   : > { %2719 = vmatprep.subr.bf16.mxu0 %v3172_v0 }
  0xda   : > { %2410 = vmatmul.mubr.f32.vlgmr.msra.gmra.mrb[0].mxu0 %v3451_v24 }
  0xdb   : > { %2721 = vmatpush3.bf16.msra.mxu0 %v3435_v13  ;;  %2428 = vmatprep.mubr.msk.f32.mxu0 %vm3173_vm0, %v3174_v1  ;;  %v926_v13 = vld [vmem:[#allocation8 + $0x8] sm:$0xff] }
  0xdc   : > { %2722 = vmatprep.subr.bf16.mxu0 %v3172_v0  ;;  %v940_v16 = vand.u32 4294901760, %v926_v13 }
  0xde   : > { %v3589_v41 = vsub.f32 %v926_v13, %v940_v16  ;;  %v1024_v13 = vand.u32 4294901760, %v1023_v8 }
  0xdf   : > { %2724 = vmatpush3.bf16.msra.mxu0 %v3444_v20  ;;  %v3572_v20 = vpack.c.bf16 %v940_v16, %v937_v15  ;;  %v1044_v16 = vsub.f32 %v3602_v49, %v1043_v11 }
  0xe0   : > { %2725 = vmatprep.subr.bf16.mxu0 %v3172_v0  ;;  %v1029_v63 = vand.u32 4294901760, %v3589_v41 }
  0xe1   : > { %2733 = vmatpush3.bf16.msra.mxu1 %v3572_v20  ;;  %v1045_v23 = vand.u32 4294901760, %v1044_v16 }
  0xe2   : > { %2734 = vmatprep.subr.bf16.mxu1 %v3172_v0  ;;  %v1030_v9 = vsub.f32 %v3589_v41, %v1029_v63  ;;  %v3671_v8 = vpack.c.bf16 %v1029_v63, %v1022_v62 }
  0xe3   : > { %2727 = vmatpush3.bf16.msra.mxu0 %v3464_v33  ;;  %v930_v33 = vld [vmem:[#allocation8 + $0x28] sm:$0xff] }
  0xe4   : > { %2728 = vmatprep.subr.bf16.mxu0 %v3172_v0  ;;  %v952_v36 = vand.u32 4294901760, %v930_v33  ;;  %v1031_v14 = vand.u32 4294901760, %v1030_v9 }
  0xe6   : > { %v3592_v42 = vpack.c.bf16 %v952_v36, %v949_v35  ;;  %v3611_v55 = vsub.f32 %v930_v33, %v952_v36  ;;  %v3646_v19 = vpack.c.bf16 %v1031_v14, %v1024_v13  ;;  %v1072_v35 = vsub.f32 %v3626_v4, %v1071_v32 }
  0xe7   : > { %2730 = vmatpush3.bf16.msra.mxu0 %v3475_v38  ;;  %v1489_v38 = vand.u32 4294901760, %v921_v34 }
  0xe8   : > { %2803 = vmatprep.subr.bf16.mxu0 %v3172_v0  ;;  %v1057_v18 = vand.u32 4294901760, %v3611_v55  ;;  %v1073_v37 = vand.u32 4294901760, %v1072_v35  ;;  %v2762_v45 = vpack.c.bf16 %v3611_v55, %v3609_v54 }
  0xe9   : > { %v3594_v43 = vpack.c.bf16 %v1492_v39, %v1489_v38  ;;  %v3614_v56 = vsub.f32 %v921_v34, %v1489_v38  ;;  %v1065_v34 = vsub.f32 %v3624_v3, %v1064_v29  ;;  %v2756_v39 = vpack.c.bf16 %v3589_v41, %v3587_v40 }
  0xea   : > { %2429 = vmatmul.mubr.f32.vlgmr.msra.gmra.mrb[0].mxu0 %v3451_v24  ;;  %v943_v24 = vand.u32 4294901760, %v927_v22  ;;  %v1604_v41 = vand.u32 4294901760, %v3630_v6 }
  0xeb   : > { %2561 = vmatprep.mubr.msk.f32.mxu0 %vm3173_vm0, %v3174_v1  ;;  %2805 = vmatpush3.bf16.msra.mxu0 %v3574_v21  ;;  %v1066_v36 = vand.u32 4294901760, %v1065_v34 }
  0xec   : > { %2806 = vmatprep.subr.bf16.mxu0 %v3172_v0  ;;  %v3580_v30 = vpack.c.bf16 %v946_v26, %v943_v24  ;;  %v3600_v48 = vsub.f32 %v927_v22, %v943_v24  ;;  %v1058_v24 = vsub.f32 %v3611_v55, %v1057_v18 }
  0xed   : > { %v3658_v38 = vpack.c.bf16 %v1073_v37, %v1066_v36 }
  0xee   : > { %2736 = vmatpush3.bf16.msra.mxu1 %v3580_v30  ;;  %v1036_v10 = vand.u32 4294901760, %v3600_v48  ;;  %v1059_v28 = vand.u32 4294901760, %v1058_v24  ;;  %v2759_v44 = vpack.c.bf16 %v3602_v49, %v3600_v48 }
  0xef   : > { %2808 = vmatpush3.bf16.msra.mxu0 %v3582_v31  ;;  %2737 = vmatprep.subr.bf16.mxu1 %v3172_v0 }
  0xf0   : > { %2809 = vmatprep.subr.bf16.mxu0 %v3172_v0  ;;  %v1037_v15 = vsub.f32 %v3600_v48, %v1036_v10  ;;  %v3654_v33 = vpack.c.bf16 %v1059_v28, %v1052_v27  ;;  %v3673_v13 = vpack.c.bf16 %v1043_v11, %v1036_v10  ;;  %v873_v28 = vsub.f32 0.0, %v3433_v12 }
  0xf2   : > { %2739 = vmatpush3.bf16.msra.mxu1 %v3592_v42  ;;  %v1038_v22 = vand.u32 4294901760, %v1037_v15  ;;  %v874_v34 = vmul.f32 1.442695, %v873_v28  ;;  %v882_v28 = vsub.s32 1, %v322_v58 }
  0xf3   : > { %2811 = vmatpush3.bf16.msra.mxu0 %v3594_v43  ;;  %2740 = vmatprep.subr.bf16.mxu1 %v3172_v0 }
  0xf4   : > { %2812 = vmatprep.subr.bf16.mxu0 %v3172_v0  ;;  %v3650_v26 = vpack.c.bf16 %v1045_v23, %v1038_v22  ;;  %v3675_v22 = vpack.c.bf16 %v1057_v18, %v1050_v17 }
  0xf6   : > { %2742 = vmatpush3.bf16.msra.mxu1 %v3622_v2 }
  0xf7   : > { %2814 = vmatpush3.bf16.msra.mxu0 %v3628_v5  ;;  %2743 = vmatprep.subr.bf16.mxu1 %v3172_v0 }
  0xf8   : > { %2827 = vmatprep.subr.bf16.mxu0 %v3172_v0 }
 0x1bd   : > { %v862_v9 = vpop.f32.mrb[0].mxu0 }
 0x1be   : > { %v2875_v14 = vadd.f32 %v862_v9, %v324_v61  ;;  %v2430_v15 = vpop.f32.mrb[1].mxu0 }
 0x1c0   : > { %v866_v16 = vsub.f32 0.0, %v2875_v14 }
 0x1c2   : > { %v867_v23 = vmul.f32 1.442695, %v866_v16 }
 0x1c4   : > { %2968 = vpow2.f32 %v867_v23 }
 0x1ce   : > { %v2969_v24 = vpop.eup %2968 }
 0x1cf   : > { %v869_v27 = vadd.f32 1.0, %v2969_v24 }
 0x1d1   : > { %2970 = vrcp.f32 %v869_v27 }
 0x1d2   : > { %2972 = vpow2.f32 %v874_v34 }
 0x1db   : > { %v2971_v62 = vpop.eup %2970 }
 0x1dc   : > { %v872_v63 = vmul.f32 3.1415927, %v2971_v62  ;;  %v2973_v35 = vpop.eup %2972 }
 0x1dd   : > { %v876_v51 = vadd.f32 1.0, %v2973_v35 }
 0x1de   : > { %v2149_v10 = vadd.f32 -1.5707964, %v872_v63 }
 0x1df   : > { %2974 = vrcp.f32 %v876_v51 }
 0x1e0   : > { %v886_v11 = vmul.f32 %v2149_v10, %v2149_v10 }
 0x1e2   : > { %v887_v36 = vmul.f32 1.6059044e-10, %v886_v11  ;;  %v900_v37 = vmul.f32 -1.1470745e-11, %v886_v11 }
 0x1e4   : > { %v888_v17 = vadd.f32 -2.5052108e-08, %v887_v36  ;;  %v901_v18 = vadd.f32 2.0876756e-09, %v900_v37 }
 0x1e6   : > { %v889_v59 = vmul.f32 %v888_v17, %v886_v11  ;;  %v902_v29 = vmul.f32 %v901_v18, %v886_v11  ;;  %v883_v17 = vrot.slane %v312_v60, %v882_v28 }
 0x1e8   : > { %v890_v32 = vadd.f32 2.7557319e-06, %v889_v59  ;;  %v903_v61 = vadd.f32 -2.755732e-07, %v902_v29 }
 0x1e9   : > { %v2975_v63 = vpop.eup %2974 }
 0x1ea   : > { %v891_v9 = vmul.f32 %v890_v32, %v886_v11  ;;  %v904_v12 = vmul.f32 %v903_v61, %v886_v11  ;;  %v879_v35 = vadd.f32 0.5, %v2975_v63  ;;  %v2828_v63 = vpack.c.bf16 %v3598_v47, %v3596_v46 }
 0x1ec   : > { %v892_v14 = vadd.f32 -0.0001984127, %v891_v9  ;;  %v905_v15 = vadd.f32 2.4801588e-05, %v904_v12  ;;  %v884_v32 = vmul.f32 %v883_v17, %v879_v35  ;;  %v2831_v35 = vpack.c.bf16 %v3607_v53, %v3605_v52 }
 0x1ed   : > { %v2837_v17 = vpack.c.bf16 %v3632_v7, %v3630_v6 }
 0x1ee   : > { %v893_v16 = vmul.f32 %v892_v14, %v886_v11  ;;  %v906_v23 = vmul.f32 %v905_v15, %v886_v11 }
 0x1f0   : > { %v894_v24 = vadd.f32 0.008333334, %v893_v16  ;;  %v907_v27 = vadd.f32 -0.0013888889, %v906_v23 }
 0x1f2   : > { %v895_v34 = vmul.f32 %v894_v24, %v886_v11  ;;  %v908_v62 = vmul.f32 %v907_v27, %v886_v11 }
 0x1f4   : > { %v896_v36 = vadd.f32 -0.16666667, %v895_v34  ;;  %v909_v37 = vadd.f32 0.041666668, %v908_v62 }
 0x1f6   : > { %v897_v18 = vmul.f32 %v896_v36, %v886_v11  ;;  %v910_v59 = vmul.f32 %v909_v37, %v886_v11 }
 0x1f8   : > { %v898_v29 = vadd.f32 1.0, %v897_v18  ;;  %v911_v51 = vadd.f32 -0.5, %v910_v59  ;;  %v1562_v18 = vand.u32 4294901760, %v3596_v46  ;;  %v1569_v59 = vand.u32 4294901760, %v3598_v47 }
 0x1fa   : > { %v899_v61 = vmul.f32 %v2149_v10, %v898_v29  ;;  %v912_v9 = vmul.f32 %v911_v51, %v886_v11  ;;  %v1583_v29 = vand.u32 4294901760, %v3607_v53  ;;  %v1590_v51 = vand.u32 4294901760, %v3614_v56 }
 0x1fb   : > { %v1563_v48 = vsub.f32 %v3596_v46, %v1562_v18  ;;  %v1570_v49 = vsub.f32 %v3598_v47, %v1569_v59 }
 0x1fc   : > { %v913_v12 = vadd.f32 1.0, %v912_v9  ;;  %v914_v14 = vsub.f32 0.0, %v899_v61 }
 0x1fd   : > { %v1564_v55 = vand.u32 4294901760, %v1563_v48  ;;  %v1571_v3 = vand.u32 4294901760, %v1570_v49 }
 0x1fe   : > { %v915_v15 = vmul.f32 %v914_v14, %v884_v32  ;;  %v916_v16 = vmul.f32 %v913_v12, %v884_v32  ;;  %v1597_v32 = vand.u32 4294901760, %v3616_v57 }
 0x1ff   : > { %v2816_v46 = vpack.c.bf16 %v1571_v3, %v1564_v55 }
 0x200   : > { %v1474_v58 = vsel %vm325_vm1, %v915_v15, 0  ;;  %v934_v23 = vsel %vm325_vm1, %v916_v16, 0  ;;  %v2858_v40 = vpack.c.bf16 %v1597_v32, %v1590_v51  ;;  %v1598_v47 = vsub.f32 %v3616_v57, %v1597_v32 }
 0x201   : > { %v3682_v24 = vand.u32 4294901760, %v1474_v58  ;;  %v3684_v27 = vand.u32 4294901760, %v934_v23 }
 0x203   : > { %v3687_v60 = vsub.f32 %v1474_v58, %v3682_v24  ;;  %v3690_v28 = vsub.f32 %v934_v23, %v3684_v27 }
 0x205   : > { %v1011_v10 = vand.u32 4294901760, %v3690_v28  ;;  %v1551_v11 = vand.u32 4294901760, %v3687_v60 }
 0x207   : > { %v1012_v34 = vsub.f32 %v3690_v28, %v1011_v10  ;;  %v1552_v62 = vsub.f32 %v3687_v60, %v1551_v11 }
 0x209   : > { %v1013_v36 = vand.u32 4294901760, %v1012_v34  ;;  %v1553_v37 = vand.u32 4294901760, %v1552_v62 }
 0x20b   : > { %2448 = vmatmul.mubr.f32.vlgmr.msra.gmra.mrb[0].mxu1 %v1013_v36  ;;  %2562 = vmatmul.mubr.f32.vlgmr.msra.gmra.mrb[2].mxu0 %v1553_v37 }
 0x20c   : > { %2745 = vmatpush3.bf16.msra.mxu1 %v3646_v19  ;;  %2829 = vmatpush3.bf16.msra.mxu0 %v2828_v63  ;;  %v2834_v19 = vpack.c.bf16 %v3616_v57, %v3614_v56 }
 0x20d   : > { %2746 = vmatprep.subr.bf16.mxu1 %v3172_v0  ;;  %2830 = vmatprep.subr.bf16.mxu0 %v3172_v0 }
 0x20e   : > { %2466 = vmatprep.mubr.msk.f32.mxu1 %vm3173_vm0, %v3174_v1  ;;  %2599 = vmatprep.mubr.msk.f32.mxu0 %vm3173_vm0, %v3174_v1 }
 0x210   : > { %2748 = vmatpush3.bf16.msra.mxu1 %v3650_v26  ;;  %2832 = vmatpush3.bf16.msra.mxu0 %v2831_v35  ;;  %v2852_v26 = vpack.c.bf16 %v1569_v59, %v1562_v18  ;;  %v2150_v59 = vld [vmem:[%s3895_s5] ss:$0 sm:$0xff] }
 0x211   : > { %2749 = vmatprep.subr.bf16.mxu1 %v3172_v0  ;;  %2833 = vmatprep.subr.bf16.mxu0 %v3172_v0 }
 0x214   : > { %2751 = vmatpush3.bf16.msra.mxu1 %v3654_v33  ;;  %2835 = vmatpush3.bf16.msra.mxu0 %v2834_v19  ;;  %v1576_v33 = vand.u32 4294901760, %v3605_v52 }
 0x215   : > { %2752 = vmatprep.subr.bf16.mxu1 %v3172_v0  ;;  %2836 = vmatprep.subr.bf16.mxu0 %v3172_v0 }
 0x216   : > { %v1577_v54 = vsub.f32 %v3605_v52, %v1576_v33 }
 0x218   : > { %2754 = vmatpush3.bf16.msra.mxu1 %v3658_v38  ;;  %2838 = vmatpush3.bf16.msra.mxu0 %v2837_v17  ;;  %v2855_v38 = vpack.c.bf16 %v1583_v29, %v1576_v33 }
 0x219   : > { %2755 = vmatprep.subr.bf16.mxu1 %v3172_v0  ;;  %2851 = vmatprep.subr.bf16.mxu0 %v3172_v0 }
 0x21b   : > { %2467 = vmatmul.mubr.f32.vlgmr.msra.gmra.mrb[2].mxu1 %v3684_v27  ;;  %2600 = vmatmul.mubr.f32.vlgmr.msra.gmra.mrb[4].mxu0 %v3687_v60 }
 0x21c   : > { %2757 = vmatpush3.bf16.msra.mxu1 %v2756_v39  ;;  %2853 = vmatpush3.bf16.msra.mxu0 %v2852_v26  ;;  %v1611_v39 = vand.u32 4294901760, %v3632_v7 }
 0x21d   : > { %2758 = vmatprep.subr.bf16.mxu1 %v3172_v0  ;;  %2854 = vmatprep.subr.bf16.mxu0 %v3172_v0 }
 0x21e   : > { %2485 = vmatprep.mubr.msk.f32.mxu1 %vm3173_vm0, %v3174_v1  ;;  %2637 = vmatprep.mubr.msk.f32.mxu0 %vm3173_vm0, %v3174_v1  ;;  %v2861_v61 = vpack.c.bf16 %v1611_v39, %v1604_v41 }
 0x220   : > { %2760 = vmatpush3.bf16.msra.mxu1 %v2759_v44  ;;  %2856 = vmatpush3.bf16.msra.mxu0 %v2855_v38  ;;  %v1591_v44 = vsub.f32 %v3614_v56, %v1590_v51 }
 0x221   : > { %2761 = vmatprep.subr.bf16.mxu1 %v3172_v0  ;;  %2857 = vmatprep.subr.bf16.mxu0 %v3172_v0 }
 0x224   : > { %2763 = vmatpush3.bf16.msra.mxu1 %v2762_v45  ;;  %2859 = vmatpush3.bf16.msra.mxu0 %v2858_v40  ;;  %v1605_v45 = vsub.f32 %v3630_v6, %v1604_v41 }
 0x225   : > { %2764 = vmatprep.subr.bf16.mxu1 %v3172_v0  ;;  %2860 = vmatprep.subr.bf16.mxu0 %v3172_v0 }
 0x226   : > { %v1606_v57 = vand.u32 4294901760, %v1605_v45 }
 0x228   : > { %2766 = vmatpush3.bf16.msra.mxu1 %v2765_v50  ;;  %2862 = vmatpush3.bf16.msra.mxu0 %v2861_v61  ;;  %v1612_v50 = vsub.f32 %v3632_v7, %v1611_v39 }
 0x229   : > { %2767 = vmatprep.subr.bf16.mxu1 %v3172_v0 }
 0x22b   : > { %2486 = vmatmul.mubr.f32.vlgmr.msra.gmra.mrb[4].mxu1 %v3690_v28  ;;  %2638 = vmatmul.mubr.f32.vlgmr.msra.gmra.mrb[6].mxu0 %v3682_v24 }
 0x22c   : > { %2769 = vmatpush3.bf16.msra.mxu1 %v3572_v20  ;;  %2504 = vmatprep.mubr.msk.f32.mxu1 %vm3173_vm0, %v3174_v1 }
 0x22d   : > { %2770 = vmatprep.subr.bf16.mxu1 %v3172_v0 }
 0x230   : > { %2772 = vmatpush3.bf16.msra.mxu1 %v3580_v30 }
 0x231   : > { %2773 = vmatprep.subr.bf16.mxu1 %v3172_v0 }
 0x234   : > { %2775 = vmatpush3.bf16.msra.mxu1 %v3592_v42 }
 0x235   : > { %2776 = vmatprep.subr.bf16.mxu1 %v3172_v0 }
 0x238   : > { %2778 = vmatpush3.bf16.msra.mxu1 %v3622_v2 }
 0x239   : > { %2779 = vmatprep.subr.bf16.mxu1 %v3172_v0 }
 0x23b   : > { %2505 = vmatmul.mubr.f32.vlgmr.msra.gmra.mrb[6].mxu1 %v1011_v10 }
 0x23c   : > { %2781 = vmatpush3.bf16.msra.mxu1 %v3671_v8  ;;  %2523 = vmatprep.mubr.msk.f32.mxu1 %vm3173_vm0, %v3174_v1 }
 0x23d   : > { %2782 = vmatprep.subr.bf16.mxu1 %v3172_v0 }
 0x240   : > { %2784 = vmatpush3.bf16.msra.mxu1 %v3673_v13 }
 0x241   : > { %2785 = vmatprep.subr.bf16.mxu1 %v3172_v0 }
 0x244   : > { %2787 = vmatpush3.bf16.msra.mxu1 %v3675_v22 }
 0x245   : > { %2788 = vmatprep.subr.bf16.mxu1 %v3172_v0 }
 0x248   : > { %2790 = vmatpush3.bf16.msra.mxu1 %v3677_v25 }
 0x249   : > { %2791 = vmatprep.subr.bf16.mxu1 %v3172_v0 }
 0x24b   : > { %2524 = vmatmul.mubr.f32.vlgmr.msra.gmra.mrb[8].mxu1 %v3684_v27 }
 0x24c   : > { %2793 = vmatpush3.bf16.msra.mxu1 %v3572_v20  ;;  %2542 = vmatprep.mubr.msk.f32.mxu1 %vm3173_vm0, %v3174_v1  ;;  %v1584_v20 = vsub.f32 %v3607_v53, %v1583_v29  ;;  %v1599_v53 = vand.u32 4294901760, %v1598_v47 }
 0x24d   : > { %2794 = vmatprep.subr.bf16.mxu1 %v3172_v0 }
 0x24e   : > { %v1585_v4 = vand.u32 4294901760, %v1584_v20 }
 0x250   : > { %2796 = vmatpush3.bf16.msra.mxu1 %v3580_v30  ;;  %v1578_v30 = vand.u32 4294901760, %v1577_v54 }
 0x251   : > { %2797 = vmatprep.subr.bf16.mxu1 %v3172_v0 }
 0x252   : > { %v2819_v52 = vpack.c.bf16 %v1585_v4, %v1578_v30 }
 0x254   : > { %2799 = vmatpush3.bf16.msra.mxu1 %v3592_v42  ;;  %v1592_v42 = vand.u32 4294901760, %v1591_v44 }
 0x255   : > { %2800 = vmatprep.subr.bf16.mxu1 %v3172_v0 }
 0x256   : > { %v2822_v56 = vpack.c.bf16 %v1599_v53, %v1592_v42 }
 0x258   : > { %2802 = vmatpush3.bf16.msra.mxu1 %v3622_v2  ;;  %v1613_v2 = vand.u32 4294901760, %v1612_v50 }
 0x259   : > { %2815 = vmatprep.subr.bf16.mxu1 %v3172_v0 }
 0x25a   : > { %v2825_v8 = vpack.c.bf16 %v1613_v2, %v1606_v57 }
 0x25b   : > { %2543 = vmatmul.mubr.f32.vlgmr.msra.gmra.mrb[10].mxu1 %v3684_v27 }
 0x25c   : > { %2817 = vmatpush3.bf16.msra.mxu1 %v2816_v46  ;;  %2580 = vmatprep.mubr.msk.f32.mxu1 %vm3173_vm0, %v3174_v1 }
 0x25d   : > { %2818 = vmatprep.subr.bf16.mxu1 %v3172_v0 }
 0x260   : > { %2820 = vmatpush3.bf16.msra.mxu1 %v2819_v52 }
 0x261   : > { %2821 = vmatprep.subr.bf16.mxu1 %v3172_v0 }
 0x264   : > { %2823 = vmatpush3.bf16.msra.mxu1 %v2822_v56 }
 0x265   : > { %2824 = vmatprep.subr.bf16.mxu1 %v3172_v0 }
 0x268   : > { %2826 = vmatpush3.bf16.msra.mxu1 %v2825_v8 }
 0x269   : > { %2839 = vmatprep.subr.bf16.mxu1 %v3172_v0 }
 0x26b   : > { %2581 = vmatmul.mubr.f32.vlgmr.msra.gmra.mrb[12].mxu1 %v3682_v24 }
 0x26c   : > { %2841 = vmatpush3.bf16.msra.mxu1 %v3574_v21  ;;  %2618 = vmatprep.mubr.msk.f32.mxu1 %vm3173_vm0, %v3174_v1 }
 0x26d   : > { %2842 = vmatprep.subr.bf16.mxu1 %v3172_v0 }
 0x270   : > { %2844 = vmatpush3.bf16.msra.mxu1 %v3582_v31 }
 0x271   : > { %2845 = vmatprep.subr.bf16.mxu1 %v3172_v0 }
 0x274   : > { %2847 = vmatpush3.bf16.msra.mxu1 %v3594_v43 }
 0x275   : > { %2848 = vmatprep.subr.bf16.mxu1 %v3172_v0 }
 0x278   : > { %2850 = vmatpush3.bf16.msra.mxu1 %v3628_v5 }
 0x279   : > { %2863 = vmatprep.subr.bf16.mxu1 %v3172_v0 }
 0x27b   : > { %2619 = vmatmul.mubr.f32.vlgmr.msra.gmra.mrb[14].mxu1 %v1551_v11 }
 0x27c   : > { %2865 = vmatpush3.bf16.msra.mxu1 %v3574_v21  ;;  %2656 = vmatprep.mubr.msk.f32.mxu1 %vm3173_vm0, %v3174_v1 }
 0x27d   : > { %2866 = vmatprep.subr.bf16.mxu1 %v3172_v0 }
 0x280   : > { %2868 = vmatpush3.bf16.msra.mxu1 %v3582_v31 }
 0x281   : > { %2869 = vmatprep.subr.bf16.mxu1 %v3172_v0 }
 0x284   : > { %2871 = vmatpush3.bf16.msra.mxu1 %v3594_v43 }
 0x285   : > { %2872 = vmatprep.subr.bf16.mxu1 %v3172_v0 }
 0x288   : > { %2874 = vmatpush3.bf16.msra.mxu1 %v3628_v5 }
 0x28b   : > { %2657 = vmatmul.mubr.f32.vlgmr.msra.gmra.mrb[16].mxu1 %v3682_v24 }
 0x2de   : > { %v1015_v6 = vpop.f32.mrb[0].mxu1  ;;  %v1555_v7 = vpop.f32.mrb[2].mxu0 }
 0x2df   : > { %v2449_v21 = vpop.f32.mrb[1].mxu1  ;;  %v2563_v13 = vpop.f32.mrb[3].mxu0 }
 0x2ee   : > { %v1126_v22 = vpop.f32.mrb[2].mxu1  ;;  %v1754_v1 = vpop.f32.mrb[4].mxu0 }
 0x2ef   : > { %v1127_v25 = vadd.f32 %v1126_v22, %v1015_v6  ;;  %v2468_v9 = vpop.f32.mrb[3].mxu1  ;;  %v2601_v12 = vpop.f32.mrb[5].mxu0 }
 0x2fe   : > { %v1214_v31 = vpop.f32.mrb[4].mxu1  ;;  %v1930_v14 = vpop.f32.mrb[6].mxu0 }
 0x2ff   : > { %v1215_v15 = vadd.f32 %v1214_v31, %v1127_v25  ;;  %v2487_v16 = vpop.f32.mrb[5].mxu1  ;;  %v2639_v43 = vpop.f32.mrb[7].mxu0 }
 0x30e   : > { %v1295_v58 = vpop.f32.mrb[6].mxu1 }
 0x30f   : > { %v1296_v0 = vadd.f32 %v1295_v58, %v1215_v15  ;;  %v2506_v23 = vpop.f32.mrb[7].mxu1 }
 0x31e   : > { %v1390_v5 = vpop.f32.mrb[8].mxu1 }
 0x31f   : > { %v1391_v27 = vadd.f32 %v1390_v5, %v1296_v0  ;;  %v2525_v24 = vpop.f32.mrb[9].mxu1 }
 0x32e   : > { %v1469_v60 = vpop.f32.mrb[10].mxu1 }
 0x32f   : > { %v1470_v28 = vadd.f32 %v1469_v60, %v1391_v27  ;;  %v2544_v10 = vpop.f32.mrb[11].mxu1 }
 0x331   : > { %v1556_v11 = vadd.f32 %v1555_v7, %v1470_v28 }
 0x33e   : > { %v1666_v34 = vpop.f32.mrb[12].mxu1 }
 0x33f   : > { %v1667_v62 = vadd.f32 %v1666_v34, %v1556_v11  ;;  %v2582_v63 = vpop.f32.mrb[13].mxu1 }
 0x341   : > { %v1755_v36 = vadd.f32 %v1754_v1, %v1667_v62 }
 0x34e   : > { %v1835_v37 = vpop.f32.mrb[14].mxu1 }
 0x34f   : > { %v1836_v35 = vadd.f32 %v1835_v37, %v1755_v36  ;;  %v2620_v19 = vpop.f32.mrb[15].mxu1 }
 0x351   : > { %v1931_v17 = vadd.f32 %v1930_v14, %v1836_v35 }
 0x35e   : > { %v2009_v18 = vpop.f32.mrb[16].mxu1 }
 0x35f   : > { %v2010_v26 = vadd.f32 %v2009_v18, %v1931_v17  ;;  %v2658_v33 = vpop.f32.mrb[17].mxu1 }
 0x361   : > { %v2020_v29 = vadd.f32 %v2150_v59, %v2010_v26 }
 0x363   : > { %2021 = vst [vmem:[%s310_s10] sm:$0xff] %v2020_v29 }
 0x364   : > { %3103 = shalt.err (!%p3100_p4)
}
 0x365   : > { %s3104_s11 = scalar_lea.hbm %s3847_s20, 128  ;;  %s3108_s19 = scalar_lea.hbm %s3896_s6, 512 }
 0x366   : > { %p3105_p13 = scmp.ne.s32.totalorder %s3847_s20, %s3104_s11  ;;  %p3109_p8 = scmp.lt.u32.totalorder %s3847_s20, %s3896_s6 }
 0x367   : > { %p3110_p12 = scmp.lt.u32.totalorder %s3108_s19, %s3104_s11  ;;  %p3112_p0 = scmp.lt.u32.totalorder %s3104_s11, %s3847_s20 }
 0x368   : > { %p3106_p9 = pnand %p3105_p13, %p3364_p5 }
 0x369   : > { %p3111_p6 = por %p3110_p12, %p3109_p8 }
 0x36a   : > { %p3107_p10 = pneg %p3106_p9 }
 0x36b   : > { %p3113_p3 = por %p3112_p0, %p3111_p6 }
 0x36d   : > { %p3114_p7 = pnand %p3113_p3, %p3107_p10 }
 0x36f   : > { %3117 = shalt.err (!%p3114_p7)
}
 0x370   : > { %2900 = dma.vmem_to_hbm [thread:$0]  (%p3364_p5), %s3849_s30, 128, %s3847_s20, %s2023_s8  }
 0x371 PF: > { %p2927_p11 = scmp.ge.s32.totalorder %s3164_s24, 2  ;;  %s2048_s10 = sand.u32 1, %s3152_s21  }
 0x372   : > { %p3914_p1 = scmp.ne.s32.totalorder %s3901_s28, 0  ;;  %s2049_s16 = scalar_lea.sflag [#allocation4], %s2048_s10 }
 0x374   : > { %p2917_p2 = pnand %p2927_p11, %p3914_p1 }
 0x376   : > { %3147 = dma.done.wait (!%p2917_p2), %s2049_s16, 128  }
 0x377   : > { %3149 = vsyncadd (!%p2917_p2), %s2049_s16, 4294967168  ;;  %p21_p4 = scmp.ge.s32.totalorder %s3350_s18, 6   ;;  %s3915_s21 = smov %s3156_s22 }
 0x378   : > { %s3916_s22 = smov %s3160_s23  ;;  %s3917_s23 = smov %s3360_s14 }
 0x379   : > { %s3918_s24 = smov %s3350_s18  ;;  %23 = sbr.rel (!%p21_p4) target bundleno = 7 (0x7), region = 101 }
 0x380   :  { %2054 = vsyncpa [#allocation3], 1 }
 0x381   :  { %2056 = vsyncpa [#allocation3 + $0x1], 1 }
 0x382   :  { %2057 = vsyncpa [#allocation6], 1 }
 0x383   :  { %2058 = vsyncpa [#allocation9], 1 }
 0x384   :  { %2059 = vsyncpa [#allocation4], 1 }
 0x385   :  { %2061 = vsyncpa [#allocation4 + $0x1], 1 }

</bundles_post_ra>
